<compile_context>
chip_gen: v7x
topology: tpu7x:2x2x1
jax: 0.10.0
libtpu: 0.0.40
codegen_flags: <defaults>
</compile_context>

<pallas_src>
import functools
import math

import jax
import jax.numpy as jnp
from jax.experimental import pallas as pl
from jax.experimental.pallas import tpu as pltpu


def _tile(dim, target, align):
    """Largest tile <= target that is a multiple of `align` and divides `dim`.
    Falls back to the full dimension (always a legal BlockSpec block size)."""
    if dim <= target:
        return dim
    t = (target // align) * align
    while t >= align:
        if dim % t == 0:
            return t
        t -= align
    return dim


# ------------------------- Tiled linear (y = x W + b) ---------------------- #

def _linear_kernel(x_ref, w_ref, b_ref, o_ref, acc_ref):
    @pl.when(pl.program_id(2) == 0)
    def _():
        acc_ref[...] = jnp.zeros_like(acc_ref)

    acc_ref[...] += jnp.dot(x_ref[...], w_ref[...],
                            preferred_element_type=jnp.float32)

    @pl.when(pl.program_id(2) == pl.num_programs(2) - 1)
    def _():
        o_ref[...] = (acc_ref[...] + b_ref[...].astype(jnp.float32)
                      ).astype(o_ref.dtype)


def linear(x, w, b, *, tm=512, tn=512, tk=512):
    """x: (M, IN), w: (IN, OUT), b: (OUT,) -> (M, OUT), tiled + pipelined."""
    M, K = x.shape
    K2, N = w.shape
    assert K == K2
    bm = _tile(M, tm, 8)
    bn = _tile(N, tn, 128)
    bk = _tile(K, tk, 128)
    grid = (M // bm, N // bn, K // bk)
    return pl.pallas_call(
        _linear_kernel,
        out_shape=jax.ShapeDtypeStruct((M, N), x.dtype),
        grid=grid,
        in_specs=[
            pl.BlockSpec((bm, bk), lambda i, j, k: (i, k)),
            pl.BlockSpec((bk, bn), lambda i, j, k: (k, j)),
            pl.BlockSpec((1, bn), lambda i, j, k: (0, j)),
        ],
        out_specs=pl.BlockSpec((bm, bn), lambda i, j, k: (i, j)),
        scratch_shapes=[pltpu.VMEM((bm, bn), jnp.float32)],
        compiler_params=pltpu.CompilerParams(
            dimension_semantics=("parallel", "parallel", "arbitrary")),
    )(x, w, b.reshape(1, N))


# ----------------------------- Attention kernel ---------------------------- #

def _attn_kernel(q_ref, k_ref, v_ref, attn_ref, ctx_ref, acc_ref, *, scale):
    kb = pl.program_id(2)

    @pl.when(kb == 0)
    def _():
        acc_ref[...] = jnp.zeros_like(acc_ref)

    q = q_ref[...]                       # (Sq, dk), native dtype (no f32 pre-cast)
    k = k_ref[...]                       # (Tk, dk)
    v = v_ref[...]                       # (Tk, dk)

    # scores[q, k] = <q[q], k[k]> / sqrt(dk); f32 accumulation on the MXU.
    s = jax.lax.dot_general(q, k, (((1,), (1,)), ((), ())),
                            preferred_element_type=jnp.float32) * scale

    # PyTorch nn.Softmax(dim=2): normalize over the QUERY axis (axis 0 here).
    # The full query axis is resident in this block, so the reduction is local
    # (no online softmax needed for key-axis tiling).
    m = jnp.max(s, axis=0, keepdims=True)
    p = jnp.exp(s - m)
    denom = jnp.sum(p, axis=0, keepdims=True)
    a = p * pl.reciprocal(denom, approx=True)   # EUP reciprocal, VPU multiply

    attn_ref[...] = a.astype(attn_ref.dtype)
    acc_ref[...] += jnp.dot(a.astype(v.dtype), v,
                            preferred_element_type=jnp.float32)

    @pl.when(kb == pl.num_programs(2) - 1)
    def _():
        ctx_ref[...] = acc_ref[...].astype(ctx_ref.dtype)


def scaled_attention(q, k, v, dk, *, key_tile=512, attn_dtype=jnp.float32):
    """q,k,v: (B, H, S, dk) -> (attn (B,H,S,S), ctx (B,H,S,dk))."""
    B, H, S, D = q.shape
    tk = _tile(S, key_tile, 128)          # key-axis tile (lane-dense attn writes)
    scale = 1.0 / math.sqrt(dk)
    kern = functools.partial(_attn_kernel, scale=scale)
    attn, ctx = pl.pallas_call(
        kern,
        out_shape=(
            jax.ShapeDtypeStruct((B, H, S, S), attn_dtype),
            jax.ShapeDtypeStruct((B, H, S, D), q.dtype),
        ),
        grid=(B, H, S // tk),
        in_specs=[
            pl.BlockSpec((None, None, S, D), lambda b, h, kb: (b, h, 0, 0)),
            pl.BlockSpec((None, None, tk, D), lambda b, h, kb: (b, h, kb, 0)),
            pl.BlockSpec((None, None, tk, D), lambda b, h, kb: (b, h, kb, 0)),
        ],
        out_specs=(
            pl.BlockSpec((None, None, S, tk), lambda b, h, kb: (b, h, 0, kb)),
            pl.BlockSpec((None, None, S, D), lambda b, h, kb: (b, h, 0, 0)),
        ),
        scratch_shapes=[pltpu.VMEM((S, D), jnp.float32)],
        compiler_params=pltpu.CompilerParams(
            dimension_semantics=("parallel", "parallel", "arbitrary")),
    )(q, k, v)
    return attn, ctx


# -------------------------------- Module glue ------------------------------ #

def init_params(key, in_features, out_features, heads=8, head_scale=False):
    head_features = out_features if head_scale else in_features
    assert head_features % heads == 0
    ks = jax.random.split(key, 8)

    def lin_init(kw, kb, fan_in, fan_out):
        bound = 1.0 / math.sqrt(fan_in)
        w = jax.random.uniform(kw, (fan_in, fan_out), jnp.float32, -bound, bound)
        b = jax.random.uniform(kb, (fan_out,), jnp.float32, -bound, bound)
        return w, b

    wq, bq = lin_init(ks[0], ks[1], in_features, head_features)
    wk, bk = lin_init(ks[2], ks[3], in_features, head_features)
    wv, bv = lin_init(ks[4], ks[5], in_features, head_features)
    wo, bo = lin_init(ks[6], ks[7], head_features, out_features)
    # Fused QKV weights: one lane-dense matmul instead of three mem-bound ones.
    wqkv = jnp.concatenate([wq, wk, wv], axis=1)
    bqkv = jnp.concatenate([bq, bk, bv], axis=0)
    return dict(wq=wq, bq=bq, wk=wk, bk=bk, wv=wv, bv=bv,
                wqkv=wqkv, bqkv=bqkv, wo=wo, bo=bo,
                heads=heads, head_features=head_features,
                dk=head_features // heads, out_features=out_features)


def multihead_self_attn(params, embeddings):
    """embeddings: (B, S, in_features) -> (out (B,S,out), attn (B,H,S,S))."""
    B, S, E = embeddings.shape
    H = params['heads']
    dk = params['dk']
    Hf = params['head_features']

    x2 = embeddings.reshape(B * S, E)
    # Fused Q/K/V projection: single tiled pallas matmul, then split.
    qkv = linear(x2, params['wqkv'], params['bqkv'])            # (B*S, 3*Hf)
    # PyTorch-style .view(B, H, S, dk): raw row-major reinterpretation.
    q = qkv[:, 0 * Hf:1 * Hf].reshape(B, H, S, dk)
    k = qkv[:, 1 * Hf:2 * Hf].reshape(B, H, S, dk)
    v = qkv[:, 2 * Hf:3 * Hf].reshape(B, H, S, dk)

    attn, ctx = scaled_attention(q, k, v, dk)

    # PyTorch-style .view(B, S, head_features)
    ctx2 = ctx.reshape(B * S, Hf)
    out = linear(ctx2, params['wo'], params['bo']).reshape(
        B, S, params['out_features'])
    return out, attn


# --------------------------------- Reference -------------------------------- #

def reference(params, x):
    B, S, E = x.shape
    H, dk, Hf = params['heads'], params['dk'], params['head_features']
    q = (x.reshape(B * S, E) @ params['wq'] + params['bq']).reshape(B, H, S, dk)
    k = (x.reshape(B * S, E) @ params['wk'] + params['bk']).reshape(B, H, S, dk)
    v = (x.reshape(B * S, E) @ params['wv'] + params['bv']).reshape(B, H, S, dk)
    s = jnp.einsum('bhqd,bhkd->bhqk', q, k) / math.sqrt(dk)
    a = jax.nn.softmax(s, axis=2)          # softmax over the QUERY axis (dim=2)
    ctx = jnp.einsum('bhqk,bhkd->bhqd', a, v).reshape(B * S, Hf)
    out = (ctx @ params['wo'] + params['bo']).reshape(B, S, params['out_features'])
    return out, a


# ----------------------------------- Main ----------------------------------- #

if __name__ == "__main__":
    B, S, IN, OUT, HEADS = 2, 8, 32, 32, 8

    key = jax.random.PRNGKey(0)
    k_param, k_x = jax.random.split(key)
    params = init_params(k_param, IN, OUT, heads=HEADS, head_scale=False)
    x = jax.random.normal(k_x, (B, S, IN), dtype=jnp.float32)

    out, attn = multihead_self_attn(params, x)
    out = jax.block_until_ready(out)
    attn = jax.block_until_ready(attn)

    ref_out, ref_attn = reference(params, x)
    assert out.shape == (B, S, OUT)
    assert attn.shape == (B, HEADS, S, S)
    # Tolerances loosened slightly vs. the f32 reference because the softmax
    # normalization uses the EUP approximate reciprocal.
    assert jnp.allclose(attn, ref_attn, atol=2e-3, rtol=2e-3), \
        float(jnp.max(jnp.abs(attn - ref_attn)))
    assert jnp.allclose(out, ref_out, atol=2e-3, rtol=2e-3), \
        float(jnp.max(jnp.abs(out - ref_out)))

    print("KERNEL_OK")
</pallas_src>

<mosaic_0001>
module attributes {stable_mosaic.version = 11 : i64} {
  func.func @_linear_kernel(%arg0: i32, %arg1: i32, %arg2: i32, %arg3: memref<16x32xf32, #tpu.memory_space<vmem>>, %arg4: memref<32x96xf32, #tpu.memory_space<vmem>>, %arg5: memref<1x96xf32, #tpu.memory_space<vmem>>, %arg6: memref<16x96xf32, #tpu.memory_space<vmem>>, %arg7: memref<16x96xf32, #tpu.memory_space<vmem>>) attributes {dimension_semantics = [#tpu.dimension_semantics<parallel>, #tpu.dimension_semantics<parallel>, #tpu.dimension_semantics<arbitrary>], iteration_bounds = array<i64: 1, 1, 1>, scalar_prefetch = 0 : i64, scratch_operands = 1 : i64, tpu.core_type = #tpu.core_type<tc>, window_params = [{transform_indices = @transform_0, window_bounds = array<i64: 16, 32>}, {transform_indices = @transform_1, window_bounds = array<i64: 32, 96>}, {transform_indices = @transform_2, window_bounds = array<i64: 1, 96>}, {transform_indices = @transform_3, window_bounds = array<i64: 16, 96>}]} {
    %c0_i32 = arith.constant 0 : i32
    %0 = arith.cmpi eq, %arg2, %c0_i32 : i32
    %1 = arith.extui %0 : i1 to i32
    %c0_i32_0 = arith.constant 0 : i32
    %2 = arith.cmpi ne, %1, %c0_i32_0 : i32
    scf.if %2 {
      %cst_10 = arith.constant 0.000000e+00 : f32
      %12 = vector.broadcast %cst_10 : f32 to vector<16x96xf32>
      %c0_11 = arith.constant 0 : index
      %c0_12 = arith.constant 0 : index
      %13 = vector.load %arg7[%c0_11, %c0_12] : memref<16x96xf32, #tpu.memory_space<vmem>>, vector<16x96xf32>
      tpu.vector_store %arg7[%c0_11, %c0_12], %12 {strides = array<i32>} : memref<16x96xf32, #tpu.memory_space<vmem>>, vector<16x96xf32>,
    } else {
    }
    %c0 = arith.constant 0 : index
    %c0_1 = arith.constant 0 : index
    %3 = vector.load %arg7[%c0, %c0_1] : memref<16x96xf32, #tpu.memory_space<vmem>>, vector<16x96xf32>
    %c0_2 = arith.constant 0 : index
    %c0_3 = arith.constant 0 : index
    %4 = vector.load %arg3[%c0_2, %c0_3] : memref<16x32xf32, #tpu.memory_space<vmem>>, vector<16x32xf32>
    %c0_4 = arith.constant 0 : index
    %c0_5 = arith.constant 0 : index
    %5 = vector.load %arg4[%c0_4, %c0_5] : memref<32x96xf32, #tpu.memory_space<vmem>>, vector<32x96xf32>
    %cst = arith.constant dense<0.000000e+00> : vector<16x96xf32>
    %6 = tpu.matmul %4, %5, %cst {dimension_numbers = #tpu.dot_dimension_numbers<[1], [0], [0], [1], [0, 0, 1, 1], [], []>} : vector<16x32xf32>, vector<32x96xf32>, vector<16x96xf32> -> vector<16x96xf32>
    %7 = arith.addf %3, %6 : vector<16x96xf32>
    %c0_6 = arith.constant 0 : index
    %c0_7 = arith.constant 0 : index
    %8 = vector.load %arg7[%c0_6, %c0_7] : memref<16x96xf32, #tpu.memory_space<vmem>>, vector<16x96xf32>
    tpu.vector_store %arg7[%c0_6, %c0_7], %7 {strides = array<i32>} : memref<16x96xf32, #tpu.memory_space<vmem>>, vector<16x96xf32>,
    %c0_i32_8 = arith.constant 0 : i32
    %9 = arith.cmpi eq, %arg2, %c0_i32_8 : i32
    %10 = arith.extui %9 : i1 to i32
    %c0_i32_9 = arith.constant 0 : i32
    %11 = arith.cmpi ne, %10, %c0_i32_9 : i32
    scf.if %11 {
      %c0_10 = arith.constant 0 : index
      %c0_11 = arith.constant 0 : index
      %12 = vector.load %arg7[%c0_10, %c0_11] : memref<16x96xf32, #tpu.memory_space<vmem>>, vector<16x96xf32>
      %c0_12 = arith.constant 0 : index
      %c0_13 = arith.constant 0 : index
      %13 = vector.load %arg5[%c0_12, %c0_13] : memref<1x96xf32, #tpu.memory_space<vmem>>, vector<1x96xf32>
      %14 = vector.broadcast %13 : vector<1x96xf32> to vector<16x96xf32>
      %15 = arith.addf %12, %14 : vector<16x96xf32>
      %c0_14 = arith.constant 0 : index
      %c0_15 = arith.constant 0 : index
      %16 = vector.load %arg6[%c0_14, %c0_15] : memref<16x96xf32, #tpu.memory_space<vmem>>, vector<16x96xf32>
      tpu.vector_store %arg6[%c0_14, %c0_15], %15 {strides = array<i32>} : memref<16x96xf32, #tpu.memory_space<vmem>>, vector<16x96xf32>,
    } else {
    }
    return
  }
  func.func @transform_0(%arg0: i32, %arg1: i32, %arg2: i32) -> (i32, i32) {
    %c0_i32 = arith.constant 0 : i32
    return %arg0, %arg2 : i32, i32
  }
  func.func @transform_1(%arg0: i32, %arg1: i32, %arg2: i32) -> (i32, i32) {
    %c0_i32 = arith.constant 0 : i32
    return %arg2, %arg1 : i32, i32
  }
  func.func @transform_2(%arg0: i32, %arg1: i32, %arg2: i32) -> (i32, i32) {
    %c0_i32 = arith.constant 0 : i32
    %c0_i32_0 = arith.constant 0 : i32
    return %c0_i32, %arg1 : i32, i32
  }
  func.func @transform_3(%arg0: i32, %arg1: i32, %arg2: i32) -> (i32, i32) {
    %c0_i32 = arith.constant 0 : i32
    return %arg0, %arg1 : i32, i32
  }
}

</mosaic_0001>

<bundles_post_ra>
// kernel: tpu_custom_call.1
= control target key start
LH: loop header
LB: loop body
LE: loop exit
PB: predicated region body
PF: predicated region fallthrough
CT: control target
= control target key end

     0   :  { %8 = vsyncpa [#allocation4], 0  ;;  %s365_s0 = inlined_call_operand.hbm [shape: f32[16,32], index: 0, kind: input, shape index: {}]   ;;  %s366_s1 = inlined_call_operand.hbm [shape: f32[32,96], index: 1, kind: input, shape index: {}]   ;;  %s367_s2 = inlined_call_operand.vmem [shape: f32[1,96], index: 2, kind: input, shape index: {}]   ;;  %s368_s3 = inlined_call_operand.hbm [shape: f32[16,96], index: 3, kind: output, shape index: {}]  }
   0x1   :  { %9 = vsyncpa [#allocation7], 0 }
   0x2   :  { %10 = vsyncpa [#allocation5], 0  ;;  %s285_s12 = smov [#allocation3]   ;;  %s213_s16 = scalar_lea.hbm %s365_s0, 256 }
   0x3   :  { %s16_s13 = sshll.u32 %s285_s12, 4  ;;  %p214_p0 = scmp.ne.s32.totalorder %s365_s0, %s213_s16  ;;  %s17_s13 = int_to_ptr.vmem [resolvable:$true] %s16_s13 }
   0x4   :  { %p217_p1 = scmp.lt.u32.totalorder %s213_s16, %s365_s0 }
   0x6   :  { %p219_p2 = pnand %p217_p1, %p214_p0 }
   0x8   :  { %222 = shalt.err (!%p219_p2)
}
   0x9   :  { %s223_s21 = scalar_lea.vmem %s17_s13, 256  ;;  %p228_p4 = scmp.lt.s32.totalorder %s17_s13, %s17_s13 }
   0xa   :  { %p224_p3 = scmp.ne.s32.totalorder %s17_s13, %s223_s21  ;;  %p229_p5 = scmp.lt.s32.totalorder %s223_s21, %s223_s21 }
   0xc   :  { %p230_p6 = por %p229_p5, %p228_p4 }
   0xe   :  { %p231_p7 = pnand %p230_p6, %p224_p3 }
  0x10   :  { %234 = shalt.err (!%p231_p7)
}
  0x11   :  { %s286_s22 = smov 128   ;;  %s287_s23 = smov 8  }
  0x12   :  { %22 = dma.hbm_to_vmem [thread:$0]  %s365_s0, 256, %s17_s13, [#allocation4], %s286_s22, %s286_s22, %s287_s23  }
  0x13   :  { %s288_s26 = smov [#allocation6]   ;;  %s235_s30 = scalar_lea.hbm %s366_s1, 512 }
  0x14   :  { %s28_s27 = sshll.u32 %s288_s26, 4  ;;  %p236_p8 = scmp.ne.s32.totalorder %s366_s1, %s235_s30  ;;  %s29_s27 = int_to_ptr.vmem [resolvable:$true] %s28_s27 }
  0x15   :  { %p239_p9 = scmp.lt.u32.totalorder %s235_s30, %s366_s1 }
  0x17   :  { %p241_p10 = pnand %p239_p9, %p236_p8 }
  0x19   :  { %244 = shalt.err (!%p241_p10)
}
  0x1a   :  { %s245_s8 = scalar_lea.vmem %s29_s27, 512  ;;  %p250_p12 = scmp.lt.s32.totalorder %s29_s27, %s29_s27 }
  0x1b   :  { %p246_p11 = scmp.ne.s32.totalorder %s29_s27, %s245_s8  ;;  %p251_p13 = scmp.lt.s32.totalorder %s245_s8, %s245_s8 }
  0x1d   :  { %p252_p0 = por %p251_p13, %p250_p12 }
  0x1f   :  { %p253_p1 = pnand %p252_p0, %p246_p11 }
  0x21   :  { %256 = shalt.err (!%p253_p1)
}
  0x22   :  { %34 = dma.hbm_to_vmem [thread:$0]  %s366_s1, 512, %s29_s27, [#allocation7], %s286_s22, %s286_s22, %s287_s23  }
  0x23   :  { %279 = dma.done.wait [#allocation4], 256  }
  0x24   :  { %280 = vsyncadd [#allocation4], 4294967040 }
  0x25   :  { %281 = dma.done.wait [#allocation7], 512  }
  0x26   :  { %282 = vsyncadd [#allocation7], 4294966784  ;;  %vm47_vm0 = vcmask 785408   ;;  %v289_v0 = vmov 0.0   ;;  %vm58_vm1 = vcmask 261120   ;;  %v54_v1 = vld [vmem:[#allocation6] sm:$0xff] }
  0x27   :  { %49 = vst.msk [vmem:[#allocation2 + $0x8] sm:$0xff] %vm47_vm0, %v289_v0  ;;  %48 = vst.msk [vmem:[#allocation2] sm:$0xff] %vm47_vm0, %v289_v0  ;;  %v55_v2 = vld [vmem:[#allocation6 + $0x8] sm:$0xff]  ;;  %v56_v3 = vld [vmem:[#allocation6 + $0x10] sm:$0xff]  ;;  %s290_s11 = smov [#allocation8]  }
  0x28   :  { %v199_v4 = vpack.c.bf16 %v55_v2, %v54_v1  ;;  %v57_v5 = vld [vmem:[#allocation6 + $0x18] sm:$0xff]  ;;  %v52_v6 = vld [vmem:[#allocation3] sm:$0xff]  ;;  %v181_v15 = vld [vmem:[%s367_s2] ss:$0 sm:$0xff]  ;;  %s166_s12 = sshll.u32 %s290_s11, 4  ;;  %s167_s12 = int_to_ptr.vmem [resolvable:$true] %s166_s12 }
  0x29   :  { %v203_v7 = vpack.c.bf16 %v57_v5, %v56_v3  ;;  %196 = vmatprep.mubr.msk.f32.mxu0 %vm58_vm1, %v52_v6  ;;  %v53_v8 = vld [vmem:[#allocation3 + $0x8] sm:$0xff]  ;;  %s257_s13 = scalar_lea.vmem %s167_s12, 256  ;;  %p262_p3 = scmp.lt.s32.totalorder %s167_s12, %s167_s12 }
  0x2a   :  { %200 = vmatprep.subr.bf16.mxu0 %v199_v4  ;;  %p258_p2 = scmp.ne.s32.totalorder %s167_s12, %s257_s13  ;;  %p263_p4 = scmp.lt.s32.totalorder %s257_s13, %s257_s13 }
  0x2b   :  { %202 = vmatpush3.bf16.msra.mxu0 %v199_v4 }
  0x2c   :  { %204 = vmatprep.subr.bf16.mxu0 %v203_v7  ;;  %p264_p5 = por %p263_p4, %p262_p3 }
  0x2e   :  { %v51_v9 = vld [vmem:[#allocation2 + $0x8] sm:$0xff]  ;;  %v50_v10 = vld [vmem:[#allocation2] sm:$0xff]  ;;  %p265_p6 = pnand %p264_p5, %p258_p2 }
  0x2f   :  { %206 = vmatpush3.bf16.msra.mxu0 %v203_v7 }
  0x32   :  { %197 = vmatmul.mubr.msk.f32.vlgmr.msra.gmra.mrb[0].mxu0 %vm58_vm1, %v53_v8 }
 0x105   :  { %v198_v11 = vpop.f32.mrb[0].mxu0 }
 0x106   :  { %v141_v12 = vadd.f32 %v198_v11, %v51_v9  ;;  %v131_v13 = vpop.f32.mrb[1].mxu0 }
 0x107   :  { %v140_v14 = vadd.f32 %v131_v13, %v50_v10 }
 0x108   :  { %144 = vst.msk [vmem:[#allocation2 + $0x8] sm:$0xff] %vm47_vm0, %v141_v12 }
 0x109   :  { %143 = vst.msk [vmem:[#allocation2] sm:$0xff] %vm47_vm0, %v140_v14 }
 0x10f   :  { %v149_v16 = vld [vmem:[#allocation2 + $0x8] sm:$0xff] }
 0x110   :  { %v148_v17 = vld [vmem:[#allocation2] sm:$0xff]  ;;  %v158_v18 = vadd.f32 %v181_v15, %v149_v16 }
 0x111   :  { %v157_v19 = vadd.f32 %v181_v15, %v148_v17 }
 0x112   :  { %160 = vst.msk [vmem:[#allocation8 + $0x8] sm:$0xff] %vm47_vm0, %v158_v18 }
 0x113   :  { %159 = vst.msk [vmem:[#allocation8] sm:$0xff] %vm47_vm0, %v157_v19 }
 0x114   :  { %268 = shalt.err (!%p265_p6)
}
 0x115   :  { %s269_s15 = scalar_lea.hbm %s368_s3, 256 }
 0x116   :  { %p270_p7 = scmp.ne.s32.totalorder %s368_s3, %s269_s15  ;;  %p273_p8 = scmp.lt.u32.totalorder %s269_s15, %s368_s3 }
 0x118   :  { %p275_p9 = pnand %p273_p8, %p270_p7 }
 0x11a   :  { %278 = shalt.err (!%p275_p9)
}
 0x11b   :  { %172 = dma.vmem_to_hbm [thread:$0]  %s167_s12, 256, %s368_s3, [#allocation5], %s286_s22, %s286_s22, %s287_s23  }
 0x11c   :  { %283 = dma.done.wait [#allocation5], 256  }
 0x11d   :  { %284 = vsyncadd [#allocation5], 4294967040 }
 0x11e   :  { %176 = vsyncpa [#allocation4], 1 }
 0x11f   :  { %177 = vsyncpa [#allocation7], 1 }
 0x120   :  { %178 = vsyncpa [#allocation5], 1 }

</bundles_post_ra>
